<compile_context>
chip_gen: v7x
topology: tpu7x:2x2x1
jax: 0.10.0
libtpu: 0.0.40
codegen_flags: <defaults>
</compile_context>

<pallas_src>
import jax
import jax.numpy as jnp
from jax.experimental import pallas as pl
from jax.experimental.pallas import tpu as pltpu


_LANES = 128  # rows per 128-lane output row; also the reshape granularity


def _pick_row_groups():
    """Row-groups (of 128 rows) per grid step, sized per TPU generation."""
    try:
        kind = jax.devices()[0].device_kind.lower()
    except Exception:
        kind = ""
    if "v6" in kind or "v7" in kind:
        # 16 MiB of double-buffered (lane-padded) inputs: fits the 32 MiB
        # default scoped VMEM on v6e/v7x with headroom.
        return 64
    # v5e (16 MiB default scoped VMEM) and older: 8 MiB double-buffered,
    # already ~80-85% of the ~0.8 TB/s HBM roofline.
    return 32


def _sad_kernel(inp_ref, tgt_ref, cos_ref):
    # Blocks: inp/tgt (TG, 128, C); cos (TG, 128) — lane-dense output tile.
    x = inp_ref[...].astype(jnp.float32)
    y = tgt_ref[...].astype(jnp.float32)
    ssx = jnp.sum(x * x, axis=-1)          # (TG, 128)  band-axis reduce (lanes)
    ssy = jnp.sum(y * y, axis=-1)
    s = jnp.sum(x * y, axis=-1)
    # Two rsqrts (EUP slot, free in this memory-bound kernel) instead of
    # rsqrt(ssx*ssy): avoids f32 overflow/underflow of the norm product.
    # Zero rows: s = 0, rsqrt(0) = inf -> 0 * inf = NaN, matching torch's 0/0.
    cos = (s * jax.lax.rsqrt(ssx)) * jax.lax.rsqrt(ssy)
    cos_ref[...] = jnp.clip(cos, -1.0, 1.0)   # clip propagates NaN, like torch.clamp


def new_sad(inp, target):
    """Pallas implementation of NewSAD.forward for 3-D inputs (B, N, C)."""
    B, N, C = inp.shape
    R = B * N
    # Pad only to a multiple of 128 (reshape requirement), NOT the tile size —
    # keeps the jnp.pad HBM copy as small/rare as possible.
    R_pad = ((R + _LANES - 1) // _LANES) * _LANES

    inp2 = inp.reshape(R, C)
    tgt2 = target.reshape(R, C)
    if R_pad != R:
        pad = ((0, R_pad - R), (0, 0))
        inp2 = jnp.pad(inp2, pad)
        tgt2 = jnp.pad(tgt2, pad)

    G = R_pad // _LANES                     # total 128-row groups
    inp3 = inp2.reshape(G, _LANES, C)       # contiguous view, zero-cost
    tgt3 = tgt2.reshape(G, _LANES, C)

    tg = min(_pick_row_groups(), G)         # row-groups per grid step
    grid = (pl.cdiv(G, tg),)                # partial last block handled by Pallas

    # VMEM budget: 2 inputs x 2 buffers x TG x 128 rows x 128 lanes (C=32 is
    # lane-padded to 128 in VMEM) x 4 B, plus headroom for output + scratch.
    vmem_bytes = 4 * tg * _LANES * _LANES * 4 + (8 << 20)

    itemsize = jnp.dtype(inp.dtype).itemsize
    cost = pl.CostEstimate(
        flops=6 * R * C,                    # 3 muls + 3 adds per band element
        transcendentals=2 * R,              # two rsqrts per row
        bytes_accessed=2 * R * C * itemsize + 4 * R,
    )

    # TODO(synk): C=32 lane-pads 4x in VMEM; packing 128//C rows per 128-lane
    # row (free wrapper reshape) needs an in-kernel segmented lane reduction
    # whose Mosaic lowering is uneven, so this optional optimization is skipped.
    cos = pl.pallas_call(
        _sad_kernel,
        out_shape=jax.ShapeDtypeStruct((G, _LANES), jnp.float32),
        grid_spec=pltpu.PrefetchScalarGridSpec(
            num_scalar_prefetch=0,
            grid=grid,
            in_specs=[
                pl.BlockSpec((tg, _LANES, C), lambda i: (i, 0, 0)),
                pl.BlockSpec((tg, _LANES, C), lambda i: (i, 0, 0)),
            ],
            out_specs=pl.BlockSpec((tg, _LANES), lambda i: (i, 0)),
        ),
        compiler_params=pltpu.CompilerParams(
            dimension_semantics=("parallel",),
            vmem_limit_bytes=vmem_bytes,
        ),
        cost_estimate=cost,
    )(inp3, tgt3)

    # TODO(synk): acos has no reliable Mosaic lowering; this tiny elementwise op
    # on the already-reduced (B*N,) cosines stays in plain JAX, matching
    # torch.acos + torch.nan_to_num. Padded / partial-block rows are dropped
    # here, before any NaN-sensitive op.
    cos_flat = cos.reshape(R_pad)[:R]
    angle = jnp.nan_to_num(jnp.arccos(cos_flat))
    return angle.reshape(B, N)


def _reference(inp, target):
    n1 = jnp.linalg.norm(inp, axis=2)
    n2 = jnp.linalg.norm(target, axis=2)
    s = jnp.sum(inp * target, axis=2)
    return jnp.nan_to_num(jnp.arccos(jnp.clip(s / (n1 * n2), -1.0, 1.0)))


if __name__ == "__main__":
    key = jax.random.PRNGKey(0)
    k1, k2 = jax.random.split(key)
    B, N, num_bands = 2, 8, 32          # small shapes; num_bands == C, reduced dim
    inp = jax.random.normal(k1, (B, N, num_bands), dtype=jnp.float32)
    target = jax.random.normal(k2, (B, N, num_bands), dtype=jnp.float32)
    # Zero-row cases exercise the 0/0 -> NaN -> nan_to_num path (both-zero and
    # one-sided-zero rows).
    inp = inp.at[0, 0].set(0.0)
    target = target.at[0, 0].set(0.0)
    inp = inp.at[0, 1].set(0.0)

    angle = jax.block_until_ready(new_sad(inp, target))
    ref = _reference(inp, target)
    assert angle.shape == (B, N)
    assert jnp.allclose(angle, ref, atol=1e-4), (angle, ref)
    print("KERNEL_OK")
</pallas_src>

<mosaic_0001>
module attributes {stable_mosaic.version = 11 : i64} {
  func.func @_sad_kernel(%arg0: i32, %arg1: memref<1x128x32xf32, #tpu.memory_space<vmem>>, %arg2: memref<1x128x32xf32, #tpu.memory_space<vmem>>, %arg3: memref<1x128xf32, #tpu.memory_space<vmem>>) attributes {dimension_semantics = [#tpu.dimension_semantics<parallel>], iteration_bounds = array<i64: 1>, scalar_prefetch = 0 : i64, scratch_operands = 0 : i64, tpu.core_type = #tpu.core_type<tc>, window_params = [{transform_indices = @transform_0, window_bounds = array<i64: 1, 128, 32>}, {transform_indices = @transform_1, window_bounds = array<i64: 1, 128, 32>}, {transform_indices = @transform_2, window_bounds = array<i64: 1, 128>}]} {
    %c0 = arith.constant 0 : index
    %c0_0 = arith.constant 0 : index
    %c0_1 = arith.constant 0 : index
    %0 = vector.load %arg1[%c0, %c0_0, %c0_1] : memref<1x128x32xf32, #tpu.memory_space<vmem>>, vector<1x128x32xf32>
    %c0_2 = arith.constant 0 : index
    %c0_3 = arith.constant 0 : index
    %c0_4 = arith.constant 0 : index
    %1 = vector.load %arg2[%c0_2, %c0_3, %c0_4] : memref<1x128x32xf32, #tpu.memory_space<vmem>>, vector<1x128x32xf32>
    %2 = arith.mulf %0, %0 : vector<1x128x32xf32>
    %cst = arith.constant dense<0.000000e+00> : vector<1x128xf32>
    %3 = vector.multi_reduction <add>, %2, %cst [2] : vector<1x128x32xf32> to vector<1x128xf32>
    %4 = arith.mulf %1, %1 : vector<1x128x32xf32>
    %cst_5 = arith.constant dense<0.000000e+00> : vector<1x128xf32>
    %5 = vector.multi_reduction <add>, %4, %cst_5 [2] : vector<1x128x32xf32> to vector<1x128xf32>
    %6 = arith.mulf %0, %1 : vector<1x128x32xf32>
    %cst_6 = arith.constant dense<0.000000e+00> : vector<1x128xf32>
    %7 = vector.multi_reduction <add>, %6, %cst_6 [2] : vector<1x128x32xf32> to vector<1x128xf32>
    %8 = math.rsqrt %3 : vector<1x128xf32>
    %9 = arith.mulf %7, %8 : vector<1x128xf32>
    %10 = math.rsqrt %5 : vector<1x128xf32>
    %11 = arith.mulf %9, %10 : vector<1x128xf32>
    %cst_7 = arith.constant -1.000000e+00 : f32
    %cst_8 = arith.constant 1.000000e+00 : f32
    %12 = vector.broadcast %cst_7 : f32 to vector<1x128xf32>
    %13 = arith.maximumf %12, %11 : vector<1x128xf32>
    %14 = vector.broadcast %cst_8 : f32 to vector<1x128xf32>
    %15 = arith.minimumf %14, %13 : vector<1x128xf32>
    %c0_9 = arith.constant 0 : index
    %c0_10 = arith.constant 0 : index
    %16 = vector.load %arg3[%c0_9, %c0_10] : memref<1x128xf32, #tpu.memory_space<vmem>>, vector<1x128xf32>
    tpu.vector_store %arg3[%c0_9, %c0_10], %15 {strides = array<i32>} : memref<1x128xf32, #tpu.memory_space<vmem>>, vector<1x128xf32>,
    return
  }
  func.func @transform_0(%arg0: i32) -> (i32, i32, i32) {
    %c0_i32 = arith.constant 0 : i32
    %c0_i32_0 = arith.constant 0 : i32
    %c0_i32_1 = arith.constant 0 : i32
    return %arg0, %c0_i32, %c0_i32_0 : i32, i32, i32
  }
  func.func @transform_1(%arg0: i32) -> (i32, i32, i32) {
    %c0_i32 = arith.constant 0 : i32
    %c0_i32_0 = arith.constant 0 : i32
    %c0_i32_1 = arith.constant 0 : i32
    return %arg0, %c0_i32, %c0_i32_0 : i32, i32, i32
  }
  func.func @transform_2(%arg0: i32) -> (i32, i32) {
    %c0_i32 = arith.constant 0 : i32
    %c0_i32_0 = arith.constant 0 : i32
    return %arg0, %c0_i32 : i32, i32
  }
}

</mosaic_0001>

<bundles_post_ra>
// kernel: tpu_custom_call.1
= control target key start
LH: loop header
LB: loop body
LE: loop exit
PB: predicated region body
PF: predicated region fallthrough
CT: control target
= control target key end

     0   :  { %vm60_vm0 = vcmask 261120   ;;  %s994_s0 = inlined_call_operand.vmem [shape: f32[1,128,32], index: 0, kind: input, shape index: {}]   ;;  %s995_s1 = inlined_call_operand.vmem [shape: f32[1,128,32], index: 1, kind: input, shape index: {}]   ;;  %s996_s2 = inlined_call_operand.hbm [shape: f32[1,128], index: 2, kind: output, shape index: {}]  }
   0x1   :  { %v600_v0 = vld [vmem:[%s994_s0 + $0x10] sm:$0xff]  ;;  %v605_v1 = vld [vmem:[%s994_s0] sm:$0xff]  ;;  %v610_v2 = vld [vmem:[%s994_s0 + $0x18] sm:$0xff] }
   0x2   :  { %v46_v3 = vmul.f32 %v600_v0, %v600_v0  ;;  %v44_v4 = vmul.f32 %v605_v1, %v605_v1  ;;  %v47_v5 = vmul.f32 %v610_v2, %v610_v2  ;;  %v621_v6 = vld [vmem:[%s994_s0 + $0x8] sm:$0xff]  ;;  %v633_v9 = vld [vmem:[%s995_s1] sm:$0xff]  ;;  %v646_v16 = vld [vmem:[%s995_s1 + $0x10] sm:$0xff] }
   0x3   :  { %v45_v7 = vmul.f32 %v621_v6, %v621_v6  ;;  %v628_v8 = vld [vmem:[%s995_s1 + $0x8] sm:$0xff]  ;;  %v109_v15 = vmul.f32 %v633_v9, %v633_v9  ;;  %v651_v17 = vld [vmem:[%s994_s0 + $0x20] sm:$0xff]  ;;  %v111_v20 = vmul.f32 %v646_v16, %v646_v16  ;;  %v662_v22 = vld [vmem:[%s995_s1 + $0x18] sm:$0xff] }
   0x4   :  { %v67_v10 = vsel %vm60_vm0, %v46_v3, 0.0  ;;  %v61_v11 = vsel %vm60_vm0, %v44_v4, 0.0  ;;  %v70_v12 = vsel %vm60_vm0, %v47_v5, 0.0  ;;  %v110_v14 = vmul.f32 %v628_v8, %v628_v8  ;;  %v667_v23 = vld [vmem:[%s994_s0 + $0x28] sm:$0xff] }
   0x5   :  { %68 = vadd.xlane.f32.xlu1 %v67_v10  ;;  %62 = vadd.xlane.f32.xlu0 %v61_v11  ;;  %v64_v13 = vsel %vm60_vm0, %v45_v7, 0.0  ;;  %v125_v19 = vsel %vm60_vm0, %v109_v15, 0.0  ;;  %v48_v21 = vmul.f32 %v651_v17, %v651_v17 }
   0x6   :  { %v128_v18 = vsel %vm60_vm0, %v110_v14, 0.0 }
   0x9   :  { %71 = vadd.xlane.f32.xlu1 %v70_v12  ;;  %65 = vadd.xlane.f32.xlu0 %v64_v13 }
   0xa   :  { %7 = vsyncpa [#allocation3], 0  ;;  %v131_v24 = vsel %vm60_vm0, %v111_v20, 0.0  ;;  %v73_v25 = vsel %vm60_vm0, %v48_v21, 0.0  ;;  %v112_v26 = vmul.f32 %v662_v22, %v662_v22  ;;  %v49_v27 = vmul.f32 %v667_v23, %v667_v23  ;;  %v678_v28 = vld [vmem:[%s995_s1 + $0x20] sm:$0xff]  ;;  %v683_v29 = vld [vmem:[%s994_s0 + $0x30] sm:$0xff] }
   0xb   :  { %v113_v32 = vmul.f32 %v678_v28, %v678_v28  ;;  %v50_v33 = vmul.f32 %v683_v29, %v683_v29  ;;  %v694_v34 = vld [vmem:[%s995_s1 + $0x28] sm:$0xff]  ;;  %v699_v35 = vld [vmem:[%s994_s0 + $0x38] sm:$0xff]  ;;  %v710_v40 = vld [vmem:[%s995_s1 + $0x30] sm:$0xff]  ;;  %v174_v14 = vmul.f32 %v628_v8, %v621_v6  ;;  %v173_v15 = vmul.f32 %v633_v9, %v605_v1 }
   0xc   :  { %v134_v30 = vsel %vm60_vm0, %v112_v26, 0.0  ;;  %v76_v31 = vsel %vm60_vm0, %v49_v27, 0.0  ;;  %v114_v38 = vmul.f32 %v694_v34, %v694_v34  ;;  %v51_v39 = vmul.f32 %v699_v35, %v699_v35  ;;  %v715_v41 = vld [vmem:[%s994_s0 + $0x40] sm:$0xff]  ;;  %v726_v46 = vld [vmem:[%s995_s1 + $0x38] sm:$0xff]  ;;  %v731_v47 = vld [vmem:[%s994_s0 + $0x48] sm:$0xff] }
   0xd   :  { %129 = vadd.xlane.f32.xlu1 %v128_v18  ;;  %126 = vadd.xlane.f32.xlu0 %v125_v19  ;;  %v137_v36 = vsel %vm60_vm0, %v113_v32, 0.0  ;;  %v79_v37 = vsel %vm60_vm0, %v50_v33, 0.0  ;;  %v115_v44 = vmul.f32 %v710_v40, %v710_v40  ;;  %v52_v45 = vmul.f32 %v715_v41, %v715_v41  ;;  %v742_v52 = vld [vmem:[%s995_s1 + $0x40] sm:$0xff]  ;;  %v747_v53 = vld [vmem:[%s994_s0 + $0x50] sm:$0xff]  ;;  %v758_v58 = vld [vmem:[%s995_s1 + $0x48] sm:$0xff] }
   0xe   :  { %v140_v42 = vsel %vm60_vm0, %v114_v38, 0.0  ;;  %v82_v43 = vsel %vm60_vm0, %v51_v39, 0.0  ;;  %v116_v50 = vmul.f32 %v726_v46, %v726_v46  ;;  %v53_v51 = vmul.f32 %v731_v47, %v731_v47  ;;  %v763_v59 = vld [vmem:[%s994_s0 + $0x58] sm:$0xff]  ;;  %v774_v3 = vld [vmem:[%s995_s1 + $0x50] sm:$0xff]  ;;  %v779_v4 = vld [vmem:[%s994_s0 + $0x60] sm:$0xff] }
   0xf   :  { %v143_v48 = vsel %vm60_vm0, %v115_v44, 0.0  ;;  %v85_v49 = vsel %vm60_vm0, %v52_v45, 0.0  ;;  %v117_v56 = vmul.f32 %v742_v52, %v742_v52  ;;  %v54_v57 = vmul.f32 %v747_v53, %v747_v53  ;;  %v39_v18 = vld [vmem:[%s995_s1 + $0x58] sm:$0xff]  ;;  %v799_v19 = vld [vmem:[%s994_s0 + $0x68] sm:$0xff]  ;;  %v808_v1 = vld [vmem:[%s994_s0 + $0x70] sm:$0xff] }
  0x10   :  { %v146_v54 = vsel %vm60_vm0, %v116_v50, 0.0  ;;  %v88_v55 = vsel %vm60_vm0, %v53_v51, 0.0  ;;  %v118_v62 = vmul.f32 %v758_v58, %v758_v58  ;;  %v55_v63 = vmul.f32 %v763_v59, %v763_v59  ;;  %v40_v27 = vld [vmem:[%s995_s1 + $0x60] sm:$0xff]  ;;  %v43_v45 = vld [vmem:[%s995_s1 + $0x78] sm:$0xff] }
  0x11   :  { %132 = vadd.xlane.f32.xlu1 %v131_v24  ;;  %74 = vadd.xlane.f32.xlu0 %v73_v25  ;;  %v149_v60 = vsel %vm60_vm0, %v117_v56, 0.0  ;;  %v91_v61 = vsel %vm60_vm0, %v54_v57, 0.0  ;;  %v119_v10 = vmul.f32 %v774_v3, %v774_v3  ;;  %v56_v11 = vmul.f32 %v779_v4, %v779_v4 }
  0x12   :  { %v152_v5 = vsel %vm60_vm0, %v118_v62, 0.0  ;;  %v94_v7 = vsel %vm60_vm0, %v55_v63, 0.0  ;;  %v192_v20 = vsel %vm60_vm0, %v174_v14, 0.0  ;;  %v189_v21 = vsel %vm60_vm0, %v173_v15, 0.0 }
  0x13   :  { %v155_v12 = vsel %vm60_vm0, %v119_v10, 0.0  ;;  %v97_v13 = vsel %vm60_vm0, %v56_v11, 0.0  ;;  %v120_v24 = vmul.f32 %v39_v18, %v39_v18  ;;  %v57_v6 = vmul.f32 %v799_v19, %v799_v19 }
  0x14   :  { %v58_v25 = vmul.f32 %v808_v1, %v808_v1  ;;  %v175_v26 = vmul.f32 %v646_v16, %v600_v0  ;;  %v176_v32 = vmul.f32 %v662_v22, %v610_v2  ;;  %v121_v33 = vmul.f32 %v40_v27, %v40_v27  ;;  %v27_v0 = vld [vmem:[%s994_s0 + $0x78] sm:$0xff]  ;;  %v42_v2 = vld [vmem:[%s995_s1 + $0x70] sm:$0xff] }
  0x15   :  { %135 = vadd.xlane.f32.xlu1 %v134_v30  ;;  %77 = vadd.xlane.f32.xlu0 %v76_v31  ;;  %v158_v8 = vsel %vm60_vm0, %v120_v24, 0.0  ;;  %v100_v9 = vsel %vm60_vm0, %v57_v6, 0.0  ;;  %v59_v39 = vmul.f32 %v27_v0, %v27_v0  ;;  %v177_v44 = vmul.f32 %v678_v28, %v651_v17 }
  0x16   :  { %v103_v30 = vsel %vm60_vm0, %v58_v25, 0.0  ;;  %v195_v31 = vsel %vm60_vm0, %v175_v26, 0.0  ;;  %v198_v16 = vsel %vm60_vm0, %v176_v32, 0.0  ;;  %v124_v50 = vmul.f32 %v43_v45, %v43_v45 }
  0x17   :  { %v178_v51 = vmul.f32 %v694_v34, %v667_v23  ;;  %v180_v28 = vmul.f32 %v726_v46, %v699_v35  ;;  %v182_v23 = vmul.f32 %v758_v58, %v731_v47  ;;  %v181_v34 = vmul.f32 %v742_v52, %v715_v41 }
  0x18   :  { %v185_v41 = vmul.f32 %v40_v27, %v779_v4  ;;  %v187_v62 = vmul.f32 %v42_v2, %v808_v1  ;;  %v349_v26 = vlaneseq  ;;  %vm360_vm1 = vcmask 130112  }
  0x19   :  { %138 = vadd.xlane.f32.xlu1 %v137_v36  ;;  %80 = vadd.xlane.f32.xlu0 %v79_v37  ;;  %v41_v36 = vld [vmem:[%s995_s1 + $0x68] sm:$0xff]  ;;  %v161_v37 = vsel %vm60_vm0, %v121_v33, 0.0  ;;  %v204_v17 = vsel %vm60_vm0, %v178_v51, 0.0  ;;  %v210_v56 = vsel %vm60_vm0, %v180_v28, 0.0  ;;  %v213_v35 = vsel %vm60_vm0, %v181_v34, 0.0  ;;  %s581_s1 = smov [#allocation2]  }
  0x1a   :  { %v122_v38 = vmul.f32 %v41_v36, %v41_v36  ;;  %v186_v58 = vmul.f32 %v41_v36, %v799_v19  ;;  %v231_v63 = vsel %vm60_vm0, %v187_v62, 0.0  ;;  %vm367_vm2 = vcmask 195712   ;;  %s468_s16 = sshll.u32 %s581_s1, 4  ;;  %s469_s16 = int_to_ptr.vmem [resolvable:$true] %s468_s16 }
  0x1b   :  { %vm374_vm3 = vcmask 261312   ;;  %vm381_vm4 = vcmask 326912   ;;  %vm388_vm5 = vcmask 392512   ;;  %vm395_vm6 = vcmask 458112   ;;  %s557_s17 = scalar_lea.vmem %s469_s16, 16  ;;  %s561_s18 = scalar_lea.vmem %s469_s16, 32 }
  0x1c   :  { %v164_v22 = vsel %vm60_vm0, %v122_v38, 0.0  ;;  %v228_v52 = vsel %vm60_vm0, %v186_v58, 0.0  ;;  %vm402_vm7 = vcmask 523712   ;;  %vm409_vm8 = vcmask 589312   ;;  %p558_p0 = scmp.ne.s32.totalorder %s469_s16, %s557_s17  ;;  %p562_p1 = scmp.lt.s32.totalorder %s469_s16, %s469_s16 }
  0x1d   :  { %141 = vadd.xlane.f32.xlu1 %v140_v42  ;;  %83 = vadd.xlane.f32.xlu0 %v82_v43  ;;  %v106_v42 = vsel %vm60_vm0, %v59_v39, 0.0  ;;  %v123_v43 = vmul.f32 %v42_v2, %v42_v2  ;;  %vm416_vm9 = vcmask 654912   ;;  %vm423_vm10 = vcmask 720512   ;;  %p563_p2 = scmp.lt.s32.totalorder %s561_s18, %s557_s17 }
  0x1e   :  { %vm430_vm11 = vcmask 786112   ;;  %vm437_vm12 = vcmask 851712   ;;  %vm444_vm13 = vcmask 917312   ;;  %vm451_vm14 = vcmask 982912  }
  0x1f   :  { %vm458_vm15 = vcmask 1048512   ;;  %p564_p3 = por %p563_p2, %p562_p1 }
  0x21   :  { %144 = vadd.xlane.f32.xlu1 %v143_v48  ;;  %86 = vadd.xlane.f32.xlu0 %v85_v49  ;;  %v167_v48 = vsel %vm60_vm0, %v123_v43, 0.0  ;;  %v201_v49 = vsel %vm60_vm0, %v177_v44, 0.0  ;;  %p565_p4 = pnand %p564_p3, %p558_p0 }
  0x25   :  { %147 = vadd.xlane.f32.xlu1 %v146_v54  ;;  %89 = vadd.xlane.f32.xlu0 %v88_v55  ;;  %v170_v54 = vsel %vm60_vm0, %v124_v50, 0.0  ;;  %v179_v55 = vmul.f32 %v710_v40, %v683_v29  ;;  %v184_v29 = vmul.f32 %v39_v18, %v763_v59  ;;  %v183_v40 = vmul.f32 %v774_v3, %v747_v53 }
  0x26   :  { %v188_v59 = vmul.f32 %v43_v45, %v27_v0  ;;  %v901_v0 = vshrl.u32 %v349_v26, 7 }
  0x27   :  { %v207_v57 = vsel %vm60_vm0, %v179_v55, 0.0  ;;  %v222_v46 = vsel %vm60_vm0, %v184_v29, 0.0  ;;  %v219_v47 = vsel %vm60_vm0, %v183_v40, 0.0 }
  0x28   :  { %v234_v53 = vsel %vm60_vm0, %v188_v59, 0.0 }
  0x29   :  { %150 = vadd.xlane.f32.xlu1 %v149_v60  ;;  %92 = vadd.xlane.f32.xlu0 %v91_v61  ;;  %v216_v60 = vsel %vm60_vm0, %v182_v23, 0.0  ;;  %v225_v61 = vsel %vm60_vm0, %v185_v41, 0.0 }
  0x2d   :  { %153 = vadd.xlane.f32.xlu1 %v152_v5  ;;  %95 = vadd.xlane.f32.xlu0 %v94_v7 }
  0x31   :  { %156 = vadd.xlane.f32.xlu1 %v155_v12  ;;  %98 = vadd.xlane.f32.xlu0 %v97_v13 }
  0x35   :  { %193 = vadd.xlane.f32.xlu1 %v192_v20  ;;  %190 = vadd.xlane.f32.xlu0 %v189_v21 }
  0x39   :  { %159 = vadd.xlane.f32.xlu1 %v158_v8  ;;  %101 = vadd.xlane.f32.xlu0 %v100_v9 }
  0x3d   :  { %104 = vadd.xlane.f32.xlu1 %v103_v30  ;;  %196 = vadd.xlane.f32.xlu0 %v195_v31  ;;  %v895_v31 = vand.u32 127, %v349_v26 }
  0x3f   :  { %v383_v26 = vadd.s32 4294967256, %v895_v31 }
  0x41   :  { %199 = vadd.xlane.f32.xlu1 %v198_v16  ;;  %162 = vadd.xlane.f32.xlu0 %v161_v37  ;;  %v355_v16 = vadd.s32 4294967288, %v895_v31 }
  0x43   :  { %v358_v44 = vsub.s32 %v355_v16, %v901_v0 }
  0x45   :  { %165 = vadd.xlane.f32.xlu1 %v164_v22  ;;  %107 = vadd.xlane.f32.xlu0 %v106_v42 }
  0x49   :  { %168 = vadd.xlane.f32.xlu1 %v167_v48  ;;  %202 = vadd.xlane.f32.xlu0 %v201_v49  ;;  %v353_v48 = vsub.s32 %v895_v31, %v901_v0 }
  0x4d   :  { %171 = vadd.xlane.f32.xlu1 %v170_v54  ;;  %205 = vadd.xlane.f32.xlu0 %v204_v17 }
  0x51   :  { %211 = vadd.xlane.f32.xlu1 %v210_v56  ;;  %208 = vadd.xlane.f32.xlu0 %v207_v57  ;;  %v362_v56 = vadd.s32 4294967280, %v895_v31 }
  0x53   :  { %v365_v40 = vsub.s32 %v362_v56, %v901_v0 }
  0x55   :  { %217 = vadd.xlane.f32.xlu1 %v216_v60  ;;  %214 = vadd.xlane.f32.xlu0 %v213_v35 }
  0x59   :  { %223 = vadd.xlane.f32.xlu1 %v222_v46  ;;  %220 = vadd.xlane.f32.xlu0 %v219_v47  ;;  %v369_v47 = vadd.s32 4294967272, %v895_v31 }
  0x5d   :  { %229 = vadd.xlane.f32.xlu1 %v228_v52  ;;  %226 = vadd.xlane.f32.xlu0 %v225_v61 }
  0x61   :  { %235 = vadd.xlane.f32.xlu1 %v234_v53  ;;  %232 = vadd.xlane.f32.xlu0 %v231_v63  ;;  %v372_v63 = vsub.s32 %v369_v47, %v901_v0 }
  0x92   :  { %v69_v3 = vpop.xlane.xlu1 %68  ;;  %v63_v5 = vpop.xlane.xlu0 %62 }
  0x93   :  { %493 = vrsqrt.f32 %v63_v5 }
  0x96   :  { %v72_v4 = vpop.xlane.xlu1 %71  ;;  %v66_v7 = vpop.xlane.xlu0 %65 }
  0x97   :  { %495 = vrsqrt.f32 %v66_v7 }
  0x9a   :  { %v130_v10 = vpop.xlane.xlu1 %129  ;;  %v127_v11 = vpop.xlane.xlu0 %126 }
  0x9b   :  { %497 = vrsqrt.f32 %v130_v10 }
  0x9c   :  { %499 = vrsqrt.f32 %v127_v11 }
  0x9d   :  { %501 = vrsqrt.f32 %v69_v3  ;;  %v494_v36 = vpop.eup %493 }
  0x9e   :  { %v133_v12 = vpop.xlane.xlu1 %132  ;;  %v75_v13 = vpop.xlane.xlu0 %74 }
  0x9f   :  { %503 = vrsqrt.f32 %v133_v12 }
  0xa0   :  { %505 = vrsqrt.f32 %v72_v4 }
  0xa1   :  { %v496_v37 = vpop.eup %495 }
  0xa2   :  { %v136_v14 = vpop.xlane.xlu1 %135  ;;  %v871_v15 = vpop.xlane.xlu0 %77 }
  0xa3   :  { %507 = vrsqrt.f32 %v136_v14 }
  0xa4   :  { %509 = vrsqrt.f32 %v75_v13 }
  0xa5   :  { %v498_v2 = vpop.eup %497 }
  0xa6   :  { %v139_v18 = vpop.xlane.xlu1 %138  ;;  %v873_v19 = vpop.xlane.xlu0 %80 }
  0xa7   :  { %v500_v43 = vpop.eup %499  ;;  %511 = vrsqrt.f32 %v139_v18 }
  0xa8   :  { %v502_v57 = vpop.eup %501  ;;  %513 = vrsqrt.f32 %v871_v15 }
  0xa9   :  { %v504_v29 = vpop.eup %503 }
  0xaa   :  { %v875_v20 = vpop.xlane.xlu1 %141  ;;  %v877_v21 = vpop.xlane.xlu0 %83 }
  0xab   :  { %v506_v58 = vpop.eup %505  ;;  %515 = vrsqrt.f32 %v875_v20  ;;  %v376_v20 = vadd.s32 4294967264, %v895_v31 }
  0xac   :  { %517 = vrsqrt.f32 %v873_v19 }
  0xad   :  { %v508_v62 = vpop.eup %507  ;;  %519 = vrsqrt.f32 %v877_v21 }
  0xae   :  { %v879_v24 = vpop.xlane.xlu1 %144  ;;  %v881_v6 = vpop.xlane.xlu0 %86 }
  0xaf   :  { %521 = vrsqrt.f32 %v879_v24  ;;  %v510_v12 = vpop.eup %509 }
  0xb1   :  { %v512_v19 = vpop.eup %511 }
  0xb2   :  { %v883_v1 = vpop.xlane.xlu1 %147  ;;  %v885_v8 = vpop.xlane.xlu0 %89 }
  0xb3   :  { %523 = vrsqrt.f32 %v883_v1  ;;  %v514_v24 = vpop.eup %513 }
  0xb4   :  { %525 = vrsqrt.f32 %v881_v6  ;;  %v397_v6 = vadd.s32 4294967240, %v895_v31 }
  0xb5   :  { %527 = vrsqrt.f32 %v885_v8  ;;  %v379_v8 = vsub.s32 %v376_v20, %v901_v0 }
  0xb6   :  { %v887_v9 = vpop.xlane.xlu1 %150  ;;  %v889_v25 = vpop.xlane.xlu0 %92 }
  0xb7   :  { %529 = vrsqrt.f32 %v887_v9  ;;  %v390_v9 = vadd.s32 4294967248, %v895_v31 }
  0xba   :  { %v891_v27 = vpop.xlane.xlu1 %153  ;;  %v893_v30 = vpop.xlane.xlu0 %95 }
  0xbb   :  { %531 = vrsqrt.f32 %v891_v27 }
  0xbc   :  { %533 = vrsqrt.f32 %v889_v25  ;;  %v386_v25 = vsub.s32 %v383_v26, %v901_v0 }
  0xbd   :  { %535 = vrsqrt.f32 %v893_v30  ;;  %v400_v30 = vsub.s32 %v397_v6, %v901_v0 }
  0xbe   :  { %v897_v32 = vpop.xlane.xlu1 %156  ;;  %v899_v33 = vpop.xlane.xlu0 %98 }
  0xbf   :  { %537 = vrsqrt.f32 %v897_v32 }
  0xc2   :  { %v194_v38 = vpop.xlane.xlu1 %193  ;;  %v191_v39 = vpop.xlane.xlu0 %190 }
  0xc3   :  { %v254_v22 = vmul.f32 %v496_v37, %v194_v38  ;;  %v253_v42 = vmul.f32 %v494_v36, %v191_v39  ;;  %v516_v37 = vpop.eup %515  ;;  %v943_v38 = vadd.s32 4294967224, %v895_v31 }
  0xc4   :  { %v518_v27 = vpop.eup %517 }
  0xc5   :  { %v286_v45 = vmul.f32 %v498_v2, %v254_v22  ;;  %v285_v49 = vmul.f32 %v500_v43, %v253_v42  ;;  %v520_v22 = vpop.eup %519 }
  0xc6   :  { %v907_v50 = vpop.xlane.xlu1 %159  ;;  %v909_v51 = vpop.xlane.xlu0 %101 }
  0xc7   :  { %v477_v54 = vclamps-f32 %v286_v45, 1.0  ;;  %v476_v17 = vclamps-f32 %v285_v49, 1.0  ;;  %539 = vrsqrt.f32 %v907_v50  ;;  %v522_v45 = vpop.eup %521  ;;  %v393_v50 = vsub.s32 %v390_v9, %v901_v0 }
  0xc8   :  { %541 = vrsqrt.f32 %v899_v33 }
  0xc9   :  { %v359_v28 = vrot.slane %v477_v54, %v358_v44  ;;  %v354_v55 = vrot.slane %v476_v17, %v353_v48  ;;  %v950_v44 = vadd.s32 4294967232, %v895_v31  ;;  %v524_v54 = vpop.eup %523  ;;  %543 = vrsqrt.f32 %v909_v51 }
  0xca   :  { %v912_v23 = vpop.xlane.xlu1 %104  ;;  %v197_v34 = vpop.xlane.xlu0 %196  ;;  %v414_v17 = vsub.s32 %v943_v38, %v901_v0  ;;  %v432_v38 = vadd.s32 4294967200, %v895_v31 }
  0xcb   :  { %v361_v60 = vsel %vm360_vm1, %v359_v28, %v354_v55  ;;  %v255_v35 = vmul.f32 %v502_v57, %v197_v34  ;;  %v526_v28 = vpop.eup %525  ;;  %545 = vrsqrt.f32 %v912_v23  ;;  %v407_v51 = vsub.s32 %v950_v44, %v901_v0 }
  0xcc   :  { %v528_v34 = vpop.eup %527 }
  0xcd   :  { %v287_v46 = vmul.f32 %v504_v29, %v255_v35  ;;  %v530_v29 = vpop.eup %529 }
  0xce   :  { %v200_v41 = vpop.xlane.xlu1 %199  ;;  %v916_v52 = vpop.xlane.xlu0 %162 }
  0xcf   :  { %v478_v61 = vclamps-f32 %v287_v46, 1.0  ;;  %v256_v59 = vmul.f32 %v506_v58, %v200_v41  ;;  %v532_v58 = vpop.eup %531  ;;  %v425_v41 = vadd.s32 4294967208, %v895_v31 }
  0xd1   :  { %v366_v53 = vrot.slane %v478_v61, %v365_v40  ;;  %v288_v3 = vmul.f32 %v508_v62, %v256_v59  ;;  %v418_v61 = vadd.s32 4294967216, %v895_v31  ;;  %v534_v59 = vpop.eup %533 }
  0xd2   :  { %v166_v5 = vpop.xlane.xlu1 %165  ;;  %v921_v4 = vpop.xlane.xlu0 %107 }
  0xd3   :  { %v368_v7 = vsel %vm367_vm2, %v366_v53, %v361_v60  ;;  %v479_v10 = vclamps-f32 %v288_v3, 1.0  ;;  %547 = vrsqrt.f32 %v166_v5 }
  0xd4   :  { %549 = vrsqrt.f32 %v916_v52  ;;  %v536_v52 = vpop.eup %535 }
  0xd5   :  { %v373_v11 = vrot.slane %v479_v10, %v372_v63  ;;  %551 = vrsqrt.f32 %v921_v4 }
  0xd6   :  { %v927_v13 = vpop.xlane.xlu1 %168  ;;  %v203_v14 = vpop.xlane.xlu0 %202 }
  0xd7   :  { %v930_v15 = vsel %vm374_vm3, %v373_v11, %v368_v7  ;;  %v257_v18 = vmul.f32 %v510_v12, %v203_v14  ;;  %553 = vrsqrt.f32 %v927_v13  ;;  %v538_v11 = vpop.eup %537 }
  0xd8   :  { %v540_v13 = vpop.eup %539 }
  0xd9   :  { %v289_v21 = vmul.f32 %v512_v19, %v257_v18 }
  0xda   :  { %v172_v1 = vpop.xlane.xlu1 %171  ;;  %v206_v36 = vpop.xlane.xlu0 %205 }
  0xdb   :  { %v258_v16 = vmul.f32 %v514_v24, %v206_v36  ;;  %v480_v39 = vclamps-f32 %v289_v21, 1.0  ;;  %555 = vrsqrt.f32 %v172_v1  ;;  %v542_v21 = vpop.eup %541  ;;  %v421_v1 = vsub.s32 %v418_v61, %v901_v0 }
  0xdc   :  { %v439_v36 = vadd.s32 4294967192, %v895_v31  ;;  %v544_v6 = vpop.eup %543 }
  0xdd   :  { %v290_v2 = vmul.f32 %v516_v37, %v258_v16  ;;  %v380_v55 = vrot.slane %v480_v39, %v379_v8  ;;  %v546_v39 = vpop.eup %545 }
  0xde   :  { %v212_v42 = vpop.xlane.xlu1 %211  ;;  %v209_v43 = vpop.xlane.xlu0 %208 }
  0xdf   :  { %v481_v48 = vclamps-f32 %v290_v2, 1.0  ;;  %v260_v32 = vmul.f32 %v520_v22, %v212_v42  ;;  %v259_v49 = vmul.f32 %v518_v27, %v209_v43  ;;  %v382_v62 = vsel %vm381_vm4, %v380_v55, %v930_v15  ;;  %v548_v42 = vpop.eup %547 }
  0xe0   :  { %v428_v15 = vsub.s32 %v425_v41, %v901_v0  ;;  %v550_v44 = vpop.eup %549 }
  0xe1   :  { %v292_v56 = vmul.f32 %v524_v54, %v260_v32  ;;  %v291_v57 = vmul.f32 %v522_v45, %v259_v49  ;;  %v387_v33 = vrot.slane %v481_v48, %v386_v25  ;;  %v453_v32 = vadd.s32 4294967176, %v895_v31  ;;  %v552_v54 = vpop.eup %551 }
  0xe2   :  { %v218_v60 = vpop.xlane.xlu1 %217  ;;  %v215_v35 = vpop.xlane.xlu0 %214  ;;  %v446_v49 = vadd.s32 4294967184, %v895_v31 }
  0xe3   :  { %v483_v40 = vclamps-f32 %v292_v56, 1.0  ;;  %v482_v46 = vclamps-f32 %v291_v57, 1.0  ;;  %v262_v47 = vmul.f32 %v528_v34, %v218_v60  ;;  %v261_v23 = vmul.f32 %v526_v28, %v215_v35  ;;  %v554_v34 = vpop.eup %553 }
  0xe4   :  { %v389_v3 = vsel %vm388_vm5, %v387_v33, %v382_v62  ;;  %v435_v28 = vsub.s32 %v432_v38, %v901_v0  ;;  %v456_v31 = vsub.s32 %v453_v32, %v901_v0 }
  0xe5   :  { %v394_v53 = vrot.slane %v482_v46, %v393_v50  ;;  %v294_v63 = vmul.f32 %v532_v58, %v262_v47  ;;  %v401_v5 = vrot.slane %v483_v40, %v400_v30  ;;  %v293_v7 = vmul.f32 %v530_v29, %v261_v23  ;;  %v556_v29 = vpop.eup %555 }
  0xe6   :  { %v224_v4 = vpop.xlane.xlu1 %223  ;;  %v221_v10 = vpop.xlane.xlu0 %220  ;;  %v449_v58 = vsub.s32 %v446_v49, %v901_v0 }
  0xe7   :  { %v396_v12 = vsel %vm395_vm6, %v394_v53, %v389_v3  ;;  %v485_v14 = vclamps-f32 %v294_v63, 1.0  ;;  %v264_v18 = vmul.f32 %v536_v52, %v224_v4  ;;  %v263_v19 = vmul.f32 %v534_v59, %v221_v10 }
  0xe8   :  { %v484_v20 = vclamps-f32 %v293_v7, 1.0  ;;  %v403_v37 = vsel %vm402_vm7, %v401_v5, %v396_v12 }
  0xe9   :  { %v296_v24 = vmul.f32 %v540_v13, %v264_v18  ;;  %v295_v26 = vmul.f32 %v538_v11, %v263_v19  ;;  %v415_v16 = vrot.slane %v485_v14, %v414_v17  ;;  %v442_v17 = vsub.s32 %v439_v36, %v901_v0 }
  0xea   :  { %v408_v8 = vrot.slane %v484_v20, %v407_v51  ;;  %v230_v9 = vpop.xlane.xlu1 %229  ;;  %v227_v27 = vpop.xlane.xlu0 %226 }
  0xeb   :  { %v487_v2 = vclamps-f32 %v296_v24, 1.0  ;;  %v486_v22 = vclamps-f32 %v295_v26, 1.0  ;;  %v266_v25 = vmul.f32 %v544_v6, %v230_v9  ;;  %v265_v30 = vmul.f32 %v542_v21, %v227_v27 }
  0xec   :  { %v410_v43 = vsel %vm409_vm8, %v408_v8, %v403_v37 }
  0xed   :  { %v422_v45 = vrot.slane %v486_v22, %v421_v1  ;;  %v298_v48 = vmul.f32 %v548_v42, %v266_v25  ;;  %v429_v50 = vrot.slane %v487_v2, %v428_v15  ;;  %v297_v55 = vmul.f32 %v550_v44, %v265_v30 }
  0xee   :  { %v236_v56 = vpop.xlane.xlu1 %235  ;;  %v233_v57 = vpop.xlane.xlu0 %232  ;;  %v417_v33 = vsel %vm416_vm9, %v415_v16, %v410_v43 }
  0xef   :  { %v489_v60 = vclamps-f32 %v298_v48, 1.0  ;;  %v268_v51 = vmul.f32 %v552_v54, %v236_v56  ;;  %v267_v35 = vmul.f32 %v546_v39, %v233_v57  ;;  %v424_v40 = vsel %vm423_vm10, %v422_v45, %v417_v33 }
  0xf0   :  { %v488_v46 = vclamps-f32 %v297_v55, 1.0  ;;  %v431_v53 = vsel %vm430_vm11, %v429_v50, %v424_v40 }
  0xf1   :  { %v300_v47 = vmul.f32 %v556_v29, %v268_v51  ;;  %v299_v23 = vmul.f32 %v554_v34, %v267_v35  ;;  %v443_v41 = vrot.slane %v489_v60, %v442_v17 }
  0xf2   :  { %v436_v61 = vrot.slane %v488_v46, %v435_v28 }
  0xf3   :  { %v491_v59 = vclamps-f32 %v300_v47, 1.0  ;;  %v490_v62 = vclamps-f32 %v299_v23, 1.0 }
  0xf4   :  { %v438_v63 = vsel %vm437_vm12, %v436_v61, %v431_v53 }
  0xf5   :  { %v457_v52 = vrot.slane %v491_v59, %v456_v31  ;;  %v450_v3 = vrot.slane %v490_v62, %v449_v58  ;;  %v445_v5 = vsel %vm444_vm13, %v443_v41, %v438_v63 }
  0xf7   :  { %v452_v7 = vsel %vm451_vm14, %v450_v3, %v445_v5 }
  0xf8   :  { %v459_v4 = vsel %vm458_vm15, %v457_v52, %v452_v7 }
  0xf9   :  { %461 = vst [vmem:[#allocation2] sm:$0x1] %v459_v4 }
  0xfa   :  { %568 = shalt.err (!%p565_p4)
}
  0xfb   :  { %s569_s21 = scalar_lea.hbm %s996_s2, 16 }
  0xfc   :  { %p570_p5 = scmp.ne.s32.totalorder %s996_s2, %s569_s21  ;;  %p573_p6 = scmp.lt.u32.totalorder %s569_s21, %s996_s2 }
  0xfe   :  { %p575_p7 = pnand %p573_p6, %p570_p5 }
 0x100   :  { %578 = shalt.err (!%p575_p7)
}
 0x101   :  { %471 = dma.vmem_to_hbm [thread:$0]  %s469_s16, 16, %s996_s2, [#allocation3]  }
 0x102   :  { %579 = dma.done.wait [#allocation3], 16  }
 0x103   :  { %580 = vsyncadd [#allocation3], 4294967280 }
 0x104   :  { %475 = vsyncpa [#allocation3], 1 }

</bundles_post_ra>
